<compile_context>
chip_gen: v7x
topology: tpu7x:2x2x1
jax: 0.10.0
libtpu: 0.0.40
codegen_flags: <defaults>
</compile_context>

<pallas_src>
import jax
import jax.numpy as jnp
from jax.experimental import pallas as pl
from jax.experimental.pallas import tpu as pltpu


def _round_up(n: int, m: int) -> int:
    return ((n + m - 1) // m) * m


def self_attention_kernel(x_ref, w1_ref, b1_ref, w2t_ref, b2_ref, out_ref):
    x = x_ref[...]                                               # (TB, Dp) f32

    # First Linear + Tanh: MXU matmul (f32 acc) + EUP tanh.
    h = jnp.tanh(
        jnp.dot(x, w1_ref[...], preferred_element_type=jnp.float32) + b1_ref[...]
    )                                                            # (TB, Hp)

    # Second Linear: (TB,Hp) x (Hp,1) as a VPU mul + XLU lane-reduce instead of
    # a 1-column MXU matmul (which would waste the whole MXU result path).
    s = jnp.sum(h * w2t_ref[...], axis=-1, keepdims=True) + b2_ref[...]   # (TB, 1)

    # Softmax over dim=1: the score axis has size 1, so
    #   exp(s - max(s, axis=1)) / sum(...) == exp(0) / 1 == 1.0 exactly.
    # Keep the exact simplified form (preserves the data dependence on the
    # scores path at essentially zero cost) and apply it as in the module.
    attn = jnp.exp(s - s)                                        # == 1.0 exactly

    out_ref[...] = (x * attn).astype(out_ref.dtype)              # broadcast (TB,1) over Dp


def self_attention(x, w1, b1, w2, b2):
    B, D = x.shape
    Dw, H = w1.shape
    assert Dw == D and b1.shape == (1, H) and w2.shape == (H, 1) and b2.shape == (1, 1)

    # Hardware-native padded shapes: lanes multiple of 128, sublanes multiple of 8.
    Dp = _round_up(D, 128)
    Hp = _round_up(H, 128)

    # Batch tile: largest multiple of 8 keeping each pipelined x/out buffer
    # ~<= 4 MiB (2 bufs x 2 arrays -> <= 16 MiB, inside the 32 MiB scoped
    # default; v7x-safe despite its halved 64 MiB VMEM).
    row_bytes = Dp * 4
    tb_cap = max(8, (((4 * 1024 * 1024) // row_bytes) // 8) * 8)
    TB = min(tb_cap, 512, _round_up(B, 8))
    Bp = _round_up(B, TB)
    num_tiles = Bp // TB

    # Zero-pad to the aligned problem. Zero padding is exact: padded features
    # contribute 0 to the matmul / reduce, and padded batch rows are sliced off.
    x_p = jnp.pad(x, ((0, Bp - B), (0, Dp - D)))
    w1_p = jnp.pad(w1, ((0, Dp - D), (0, Hp - H)))
    b1_p = jnp.pad(b1, ((0, 0), (0, Hp - H)))
    w2t_p = jnp.pad(w2.T, ((0, 0), (0, Hp - H)))                 # (1, Hp)
    b2_p = b2                                                    # (1, 1)

    cost = pl.CostEstimate(
        flops=2 * Bp * Dp * Hp + 3 * Bp * Hp + Bp * Dp,
        transcendentals=Bp * Hp + Bp,                            # tanh + exp
        bytes_accessed=(2 * Bp * Dp + Dp * Hp + 2 * Hp + 1) * 4,
    )

    out_p = pl.pallas_call(
        self_attention_kernel,
        out_shape=jax.ShapeDtypeStruct((Bp, Dp), x.dtype),
        grid=(num_tiles,),
        in_specs=[
            pl.BlockSpec((TB, Dp), lambda i: (i, 0)),            # x: tiled over batch
            pl.BlockSpec((Dp, Hp), lambda i: (0, 0)),            # w1: pinned
            pl.BlockSpec((1, Hp), lambda i: (0, 0)),             # b1: pinned
            pl.BlockSpec((1, Hp), lambda i: (0, 0)),             # w2^T: pinned
            pl.BlockSpec((1, 1), lambda i: (0, 0)),              # b2: pinned
        ],
        out_specs=pl.BlockSpec((TB, Dp), lambda i: (i, 0)),
        compiler_params=pltpu.CompilerParams(
            dimension_semantics=("parallel",),                   # megacore / 2-TC split
        ),
        cost_estimate=cost,
    )(x_p, w1_p, b1_p, w2t_p, b2_p)

    return out_p[:B, :D]


def reference(x, w1, b1, w2, b2):
    h = jnp.tanh(x @ w1 + b1)
    s = h @ w2 + b2
    attn = jax.nn.softmax(s, axis=1)
    return x * attn


if __name__ == "__main__":
    B, D, H = 8, 32, 64   # batch, input_dim, hidden_dim

    key = jax.random.PRNGKey(0)
    kx, k1, kb1, k2, kb2 = jax.random.split(key, 5)

    x = jax.random.normal(kx, (B, D), dtype=jnp.float32)
    # Deterministic synthetic parameters (uniform, roughly PyTorch-Linear scale).
    w1 = jax.random.uniform(k1, (D, H), minval=-1.0 / D**0.5, maxval=1.0 / D**0.5, dtype=jnp.float32)
    b1 = jax.random.uniform(kb1, (1, H), minval=-1.0 / D**0.5, maxval=1.0 / D**0.5, dtype=jnp.float32)
    w2 = jax.random.uniform(k2, (H, 1), minval=-1.0 / H**0.5, maxval=1.0 / H**0.5, dtype=jnp.float32)
    b2 = jax.random.uniform(kb2, (1, 1), minval=-1.0 / H**0.5, maxval=1.0 / H**0.5, dtype=jnp.float32)

    out = self_attention(x, w1, b1, w2, b2)
    jax.block_until_ready(out)

    ref = reference(x, w1, b1, w2, b2)
    assert out.shape == (B, D)
    assert jnp.allclose(out, ref, atol=1e-5, rtol=1e-5), "mismatch vs reference"

    print("KERNEL_OK")
</pallas_src>

<mosaic_0001>
module attributes {stable_mosaic.version = 11 : i64} {
  func.func @self_attention_kernel(%arg0: i32, %arg1: memref<8x128xf32, #tpu.memory_space<vmem>>, %arg2: memref<128x128xf32, #tpu.memory_space<vmem>>, %arg3: memref<1x128xf32, #tpu.memory_space<vmem>>, %arg4: memref<1x128xf32, #tpu.memory_space<vmem>>, %arg5: memref<1x1xf32, #tpu.memory_space<vmem>>, %arg6: memref<8x128xf32, #tpu.memory_space<vmem>>) attributes {dimension_semantics = [#tpu.dimension_semantics<parallel>], iteration_bounds = array<i64: 1>, scalar_prefetch = 0 : i64, scratch_operands = 0 : i64, tpu.core_type = #tpu.core_type<tc>, window_params = [{transform_indices = @transform_0, window_bounds = array<i64: 8, 128>}, {pipeline_mode = #tpu.pipeline_mode<synchronous>, transform_indices = @transform_1, window_bounds = array<i64: 128, 128>}, {pipeline_mode = #tpu.pipeline_mode<synchronous>, transform_indices = @transform_2, window_bounds = array<i64: 1, 128>}, {pipeline_mode = #tpu.pipeline_mode<synchronous>, transform_indices = @transform_3, window_bounds = array<i64: 1, 128>}, {pipeline_mode = #tpu.pipeline_mode<synchronous>, transform_indices = @transform_4, window_bounds = array<i64: 1, 1>}, {transform_indices = @transform_5, window_bounds = array<i64: 8, 128>}]} {
    %c0 = arith.constant 0 : index
    %c0_0 = arith.constant 0 : index
    %0 = vector.load %arg1[%c0, %c0_0] : memref<8x128xf32, #tpu.memory_space<vmem>>, vector<8x128xf32>
    %c0_1 = arith.constant 0 : index
    %c0_2 = arith.constant 0 : index
    %1 = vector.load %arg2[%c0_1, %c0_2] : memref<128x128xf32, #tpu.memory_space<vmem>>, vector<128x128xf32>
    %cst = arith.constant dense<0.000000e+00> : vector<8x128xf32>
    %2 = tpu.matmul %0, %1, %cst {dimension_numbers = #tpu.dot_dimension_numbers<[1], [0], [0], [1], [0, 0, 1, 1], [], []>} : vector<8x128xf32>, vector<128x128xf32>, vector<8x128xf32> -> vector<8x128xf32>
    %c0_3 = arith.constant 0 : index
    %c0_4 = arith.constant 0 : index
    %3 = vector.load %arg3[%c0_3, %c0_4] : memref<1x128xf32, #tpu.memory_space<vmem>>, vector<1x128xf32>
    %4 = vector.broadcast %3 : vector<1x128xf32> to vector<8x128xf32>
    %5 = arith.addf %2, %4 : vector<8x128xf32>
    %6 = math.tanh %5 : vector<8x128xf32>
    %c0_5 = arith.constant 0 : index
    %c0_6 = arith.constant 0 : index
    %7 = vector.load %arg4[%c0_5, %c0_6] : memref<1x128xf32, #tpu.memory_space<vmem>>, vector<1x128xf32>
    %8 = vector.broadcast %7 : vector<1x128xf32> to vector<8x128xf32>
    %9 = arith.mulf %6, %8 : vector<8x128xf32>
    %cst_7 = arith.constant dense<0.000000e+00> : vector<8xf32>
    %10 = vector.multi_reduction <add>, %9, %cst_7 [1] : vector<8x128xf32> to vector<8xf32>
    %11 = vector.shape_cast %10 : vector<8xf32> to vector<8x1xf32>
    %c0_8 = arith.constant 0 : index
    %c0_9 = arith.constant 0 : index
    %12 = vector.load %arg5[%c0_8, %c0_9] : memref<1x1xf32, #tpu.memory_space<vmem>>, vector<1x1xf32>
    %13 = vector.broadcast %12 : vector<1x1xf32> to vector<8x1xf32>
    %14 = arith.addf %11, %13 : vector<8x1xf32>
    %15 = arith.subf %14, %14 : vector<8x1xf32>
    %16 = math.exp %15 : vector<8x1xf32>
    %17 = vector.broadcast %16 : vector<8x1xf32> to vector<8x128xf32>
    %18 = arith.mulf %0, %17 : vector<8x128xf32>
    %c0_10 = arith.constant 0 : index
    %c0_11 = arith.constant 0 : index
    %19 = vector.load %arg6[%c0_10, %c0_11] : memref<8x128xf32, #tpu.memory_space<vmem>>, vector<8x128xf32>
    tpu.vector_store %arg6[%c0_10, %c0_11], %18 {strides = array<i32>} : memref<8x128xf32, #tpu.memory_space<vmem>>, vector<8x128xf32>,
    return
  }
  func.func @transform_0(%arg0: i32) -> (i32, i32) {
    %c0_i32 = arith.constant 0 : i32
    %c0_i32_0 = arith.constant 0 : i32
    return %arg0, %c0_i32 : i32, i32
  }
  func.func @transform_1(%arg0: i32) -> (i32, i32) {
    %c0_i32 = arith.constant 0 : i32
    %c0_i32_0 = arith.constant 0 : i32
    %c0_i32_1 = arith.constant 0 : i32
    return %c0_i32, %c0_i32_0 : i32, i32
  }
  func.func @transform_2(%arg0: i32) -> (i32, i32) {
    %c0_i32 = arith.constant 0 : i32
    %c0_i32_0 = arith.constant 0 : i32
    %c0_i32_1 = arith.constant 0 : i32
    return %c0_i32, %c0_i32_0 : i32, i32
  }
  func.func @transform_3(%arg0: i32) -> (i32, i32) {
    %c0_i32 = arith.constant 0 : i32
    %c0_i32_0 = arith.constant 0 : i32
    %c0_i32_1 = arith.constant 0 : i32
    return %c0_i32, %c0_i32_0 : i32, i32
  }
  func.func @transform_4(%arg0: i32) -> (i32, i32) {
    %c0_i32 = arith.constant 0 : i32
    %c0_i32_0 = arith.constant 0 : i32
    %c0_i32_1 = arith.constant 0 : i32
    return %c0_i32, %c0_i32_0 : i32, i32
  }
  func.func @transform_5(%arg0: i32) -> (i32, i32) {
    %c0_i32 = arith.constant 0 : i32
    %c0_i32_0 = arith.constant 0 : i32
    return %arg0, %c0_i32 : i32, i32
  }
}

</mosaic_0001>

<bundles_post_ra>
// kernel: tpu_custom_call.1
= control target key start
LH: loop header
LB: loop body
LE: loop exit
PB: predicated region body
PF: predicated region fallthrough
CT: control target
= control target key end

     0   :  { %s444_s0 = inlined_call_operand.hbm [shape: f32[8,128], index: 0, kind: input, shape index: {}]   ;;  %s445_s1 = inlined_call_operand.hbm [shape: f32[128,128], index: 1, kind: input, shape index: {}]   ;;  %s446_s2 = inlined_call_operand.vmem [shape: f32[1,128], index: 2, kind: input, shape index: {}]   ;;  %s447_s3 = inlined_call_operand.vmem [shape: f32[1,128], index: 3, kind: input, shape index: {}]   ;;  %s448_s4 = inlined_call_operand.<no memory space> [shape: f32[1,1], index: 4, kind: input, shape index: {}]   ;;  %s449_s5 = inlined_call_operand.hbm [shape: f32[8,128], index: 5, kind: output, shape index: {}]  }
   0x1   :  { %v10_v0 = vstv %s448_s4 }
   0x2   :  { %11 = vst [vmem:[#allocation2] sm:$0x1] %v10_v0 }
   0x3   :  { %12 = vsyncpa [#allocation4], 0 }
   0x4   :  { %13 = vsyncpa [#allocation7], 0 }
   0x5   :  { %14 = vsyncpa [#allocation5], 0  ;;  %s353_s20 = smov [#allocation3]   ;;  %s354_s22 = smov [#allocation6]  }
   0x6   :  { %s21_s21 = sshll.u32 %s353_s20, 4  ;;  %s30_s23 = sshll.u32 %s354_s22, 4  ;;  %s22_s21 = int_to_ptr.vmem [resolvable:$true] %s21_s21  ;;  %s395_s23 = int_to_ptr.vmem [resolvable:$true] %s30_s23 }
   0x7   :  { %s281_s26 = scalar_lea.hbm %s444_s0, 128 }
   0x8   :  { %p282_p0 = scmp.ne.s32.totalorder %s444_s0, %s281_s26  ;;  %p285_p1 = scmp.lt.u32.totalorder %s281_s26, %s444_s0 }
   0xa   :  { %p287_p2 = pnand %p285_p1, %p282_p0 }
   0xc   :  { %290 = shalt.err (!%p287_p2)
}
   0xd   :  { %s291_s30 = scalar_lea.vmem %s22_s21, 128  ;;  %p296_p4 = scmp.lt.s32.totalorder %s22_s21, %s22_s21 }
   0xe   :  { %p292_p3 = scmp.ne.s32.totalorder %s22_s21, %s291_s30  ;;  %p297_p5 = scmp.lt.s32.totalorder %s291_s30, %s291_s30 }
  0x10   :  { %p298_p6 = por %p297_p5, %p296_p4 }
  0x12   :  { %p299_p7 = pnand %p298_p6, %p292_p3 }
  0x14   :  { %302 = shalt.err (!%p299_p7)
}
  0x15   :  { %24 = dma.hbm_to_vmem [thread:$0]  %s444_s0, 128, %s22_s21, [#allocation4]  }
  0x16   :  { %s303_s10 = scalar_lea.hbm %s445_s1, 2048 }
  0x17   :  { %p304_p8 = scmp.ne.s32.totalorder %s445_s1, %s303_s10  ;;  %p307_p9 = scmp.lt.u32.totalorder %s303_s10, %s445_s1 }
  0x19   :  { %p309_p10 = pnand %p307_p9, %p304_p8 }
  0x1b   :  { %312 = shalt.err (!%p309_p10)
}
  0x1c   :  { %s313_s15 = scalar_lea.vmem %s395_s23, 2048  ;;  %p318_p12 = scmp.lt.s32.totalorder %s395_s23, %s395_s23 }
  0x1d   :  { %p314_p11 = scmp.ne.s32.totalorder %s395_s23, %s313_s15  ;;  %p319_p13 = scmp.lt.s32.totalorder %s313_s15, %s313_s15 }
  0x1f   :  { %p320_p0 = por %p319_p13, %p318_p12 }
  0x21   :  { %p321_p1 = pnand %p320_p0, %p314_p11 }
  0x23   :  { %324 = shalt.err (!%p321_p1)
}
  0x24   :  { %s355_s0 = smov 128   ;;  %s356_s16 = smov 8  }
  0x25   :  { %36 = dma.hbm_to_vmem [thread:$0]  %s445_s1, 2048, %s395_s23, [#allocation7], %s355_s0, %s355_s0, %s356_s16  }
  0x26   :  { %347 = dma.done.wait [#allocation4], 128  }
  0x27   :  { %348 = vsyncadd [#allocation4], 4294967168 }
  0x28   :  { %349 = dma.done.wait [#allocation7], 2048  }
  0x29   :  { %350 = vsyncadd [#allocation7], 4294965248  ;;  %v357_v1 = vmov 0.0|0.0   ;;  %vm358_vm0 = vmmov 0   ;;  %v359_v2 = vmov 0.0   ;;  %v50_v3 = vld [vmem:[#allocation6] sm:$0xff] }
  0x2a   :  { %243 = vmatprep.subr.bf16.mxu0 %v357_v1  ;;  %240 = vmatprep.mubr.msk.f32.mxu0 %vm358_vm0, %v359_v2  ;;  %v51_v4 = vld [vmem:[#allocation6 + $0x8] sm:$0xff]  ;;  %v52_v5 = vld [vmem:[#allocation6 + $0x10] sm:$0xff]  ;;  %v53_v7 = vld [vmem:[#allocation6 + $0x18] sm:$0xff]  ;;  %v360_v35 = vmov 0  }
  0x2b   :  { %v244_v6 = vpack.c.bf16 %v51_v4, %v50_v3  ;;  %v247_v8 = vpack.c.bf16 %v53_v7, %v52_v5  ;;  %v54_v9 = vld [vmem:[#allocation6 + $0x20] sm:$0xff]  ;;  %v55_v10 = vld [vmem:[#allocation6 + $0x28] sm:$0xff]  ;;  %v56_v12 = vld [vmem:[#allocation6 + $0x30] sm:$0xff]  ;;  %276 = vset.pattern.permute.xlu0 %v360_v35 }
  0x2c   :  { %v250_v11 = vpack.c.bf16 %v55_v10, %v54_v9  ;;  %v57_v13 = vld [vmem:[#allocation6 + $0x38] sm:$0xff]  ;;  %v58_v15 = vld [vmem:[#allocation6 + $0x40] sm:$0xff]  ;;  %v59_v16 = vld [vmem:[#allocation6 + $0x48] sm:$0xff] }
  0x2d   :  { %245 = vmatpush3.bf16.msra.mxu0 %v244_v6  ;;  %v253_v14 = vpack.c.bf16 %v57_v13, %v56_v12  ;;  %v256_v17 = vpack.c.bf16 %v59_v16, %v58_v15  ;;  %v60_v18 = vld [vmem:[#allocation6 + $0x50] sm:$0xff]  ;;  %v61_v19 = vld [vmem:[#allocation6 + $0x58] sm:$0xff]  ;;  %v62_v21 = vld [vmem:[#allocation6 + $0x60] sm:$0xff] }
  0x2e   :  { %246 = vmatprep.subr.bf16.mxu0 %v357_v1  ;;  %v259_v20 = vpack.c.bf16 %v61_v19, %v60_v18  ;;  %v63_v22 = vld [vmem:[#allocation6 + $0x68] sm:$0xff]  ;;  %v64_v24 = vld [vmem:[#allocation6 + $0x70] sm:$0xff]  ;;  %v65_v25 = vld [vmem:[#allocation6 + $0x78] sm:$0xff] }
  0x2f   :  { %v262_v23 = vpack.c.bf16 %v63_v22, %v62_v21  ;;  %v265_v26 = vpack.c.bf16 %v65_v25, %v64_v24  ;;  %v49_v27 = vld [vmem:[#allocation3] sm:$0xff]  ;;  %v188_v28 = vld [vmem:[%s446_s2] ss:$0 sm:$0xff]  ;;  %s361_s2 = smov [#allocation8]  }
  0x30   :  { %v189_v32 = vld [vmem:[%s447_s3] ss:$0 sm:$0xff]  ;;  %s178_s22 = sshll.u32 %s361_s2, 4  ;;  %s179_s22 = int_to_ptr.vmem [resolvable:$true] %s178_s22 }
  0x31   :  { %248 = vmatpush3.bf16.msra.mxu0 %v247_v8  ;;  %v190_v36 = vld [vmem:[#allocation2] ss:$0 sm:$0xff]  ;;  %s325_s3 = scalar_lea.vmem %s179_s22, 128  ;;  %p330_p3 = scmp.lt.s32.totalorder %s179_s22, %s179_s22 }
  0x32   :  { %249 = vmatprep.subr.bf16.mxu0 %v357_v1  ;;  %p326_p2 = scmp.ne.s32.totalorder %s179_s22, %s325_s3  ;;  %p331_p4 = scmp.lt.s32.totalorder %s325_s3, %s325_s3 }
  0x34   :  { %p332_p5 = por %p331_p4, %p330_p3 }
  0x35   :  { %251 = vmatpush3.bf16.msra.mxu0 %v250_v11 }
  0x36   :  { %252 = vmatprep.subr.bf16.mxu0 %v357_v1  ;;  %p333_p6 = pnand %p332_p5, %p326_p2 }
  0x39   :  { %254 = vmatpush3.bf16.msra.mxu0 %v253_v14 }
  0x3a   :  { %255 = vmatprep.subr.bf16.mxu0 %v357_v1 }
  0x3d   :  { %257 = vmatpush3.bf16.msra.mxu0 %v256_v17 }
  0x3e   :  { %258 = vmatprep.subr.bf16.mxu0 %v357_v1 }
  0x41   :  { %260 = vmatpush3.bf16.msra.mxu0 %v259_v20 }
  0x42   :  { %261 = vmatprep.subr.bf16.mxu0 %v357_v1 }
  0x45   :  { %263 = vmatpush3.bf16.msra.mxu0 %v262_v23 }
  0x46   :  { %264 = vmatprep.subr.bf16.mxu0 %v357_v1 }
  0x49   :  { %266 = vmatpush3.bf16.msra.mxu0 %v265_v26 }
  0x4c   :  { %241 = vmatmul.mubr.f32.vlgmr.msra.gmra.mrb[0].mxu0 %v49_v27 }
 0x11f   :  { %v139_v29 = vpop.f32.mrb[0].mxu0 }
 0x120   :  { %v140_v30 = vadd.f32 %v188_v28, %v139_v29  ;;  %v242_v31 = vpop.f32.mrb[1].mxu0 }
 0x122   :  { %277 = vtanh.f32 %v140_v30 }
 0x12c   :  { %v278_v33 = vpop.eup %277 }
 0x12d   :  { %v151_v34 = vmul.f32 %v278_v33, %v189_v32 }
 0x12f   :  { %152 = vadd.xlane.f32.xlu0 %v151_v34 }
 0x1bc   :  { %v153_v37 = vpop.xlane.xlu0 %152 }
 0x1bd   :  { %v161_v38 = vadd.f32 %v190_v36, %v153_v37 }
 0x1bf   :  { %v162_v39 = vsub.f32 %v161_v38, %v161_v38 }
 0x1c1   :  { %v163_v40 = vmul.f32 1.442695, %v162_v39 }
 0x1c3   :  { %279 = vpow2.f32 %v163_v40 }
 0x1cd   :  { %v280_v41 = vpop.eup %279 }
 0x1ce   :  { %167 = vperm.xlu0 %276, %v280_v41  }
 0x24d   :  { %v168_v42 = vpop.permute.xlu0 %167 }
 0x24e   :  { %v170_v43 = vmul.f32 %v168_v42, %v49_v27 }
 0x250   :  { %171 = vst [vmem:[#allocation8] sm:$0xff] %v170_v43 }
 0x251   :  { %336 = shalt.err (!%p333_p6)
}
 0x252   :  { %s337_s25 = scalar_lea.hbm %s449_s5, 128 }
 0x253   :  { %p338_p7 = scmp.ne.s32.totalorder %s449_s5, %s337_s25  ;;  %p341_p8 = scmp.lt.u32.totalorder %s337_s25, %s449_s5 }
 0x255   :  { %p343_p9 = pnand %p341_p8, %p338_p7 }
 0x257   :  { %346 = shalt.err (!%p343_p9)
}
 0x258   :  { %181 = dma.vmem_to_hbm [thread:$0]  %s179_s22, 128, %s449_s5, [#allocation5]  }
 0x259   :  { %351 = dma.done.wait [#allocation5], 128  }
 0x25a   :  { %352 = vsyncadd [#allocation5], 4294967168 }
 0x25b   :  { %185 = vsyncpa [#allocation4], 1 }
 0x25c   :  { %186 = vsyncpa [#allocation7], 1 }
 0x25d   :  { %187 = vsyncpa [#allocation5], 1 }

</bundles_post_ra>
